<compile_context>
chip_gen: v6e
topology: v6e:2x2x1
jax: 0.10.0
libtpu: 0.0.40
codegen_flags: <defaults>
</compile_context>

<pallas_src>
import functools

import jax
import jax.numpy as jnp
from jax.experimental import pallas as pl
from jax.experimental.pallas import tpu as pltpu


# ----------------------------------------------------------------------------
# Kernels
# ----------------------------------------------------------------------------
def _xw1_kernel(x_ref, w1_ref, out_ref):
    """XW1[rows] = X[rows] @ W1  (hoisted out of the propagation loop)."""
    out_ref[...] = jnp.dot(
        x_ref[...], w1_ref[...], preferred_element_type=jnp.float32
    ).astype(out_ref.dtype)


def _layer1_kernel(ahat_ref, xw1_ref, w2_ref, b1_ref, out_ref):
    """HW2[rows] = relu(Ahat[rows, :] @ XW1 + b1) @ W2  (H never leaves VMEM)."""
    prop = jnp.dot(ahat_ref[...], xw1_ref[...], preferred_element_type=jnp.float32)
    h = jnp.maximum(prop + b1_ref[...], 0.0)
    # TODO(synk): dropout(p>0, training) not implemented; module default p=0.0 is identity.
    hw2 = jnp.dot(
        h.astype(jnp.bfloat16), w2_ref[...], preferred_element_type=jnp.float32
    )
    out_ref[...] = hw2.astype(out_ref.dtype)


def _layer2_kernel(ahat_ref, hw2_ref, b2_ref, out_ref, *, n_classes):
    """Z[rows] = Ahat[rows, :] @ HW2 + b2 ; out = log_softmax over valid classes."""
    z = jnp.dot(ahat_ref[...], hw2_ref[...], preferred_element_type=jnp.float32)
    z = z + b2_ref[...]
    # Class dim is zero-padded to 128 lanes; mask padded columns out of the softmax.
    col = jax.lax.broadcasted_iota(jnp.int32, z.shape, 1)
    valid = col < n_classes
    z_masked = jnp.where(valid, z, jnp.float32(-1e30))
    m = jnp.max(z_masked, axis=1, keepdims=True)
    e = jnp.where(valid, jnp.exp(z - m), 0.0)
    lse = jnp.log(jnp.sum(e, axis=1, keepdims=True))
    out_ref[...] = (z - m) - lse


# ----------------------------------------------------------------------------
# Wrapper
# ----------------------------------------------------------------------------
def _round_up(x, m):
    return ((x + m - 1) // m) * m


def _pad2(a, rows, cols):
    return jnp.pad(a, ((0, rows - a.shape[0]), (0, cols - a.shape[1])))


def gcn_forward(ahat, x, w1, b1, w2, b2, *, tile_m=256):
    n, f = x.shape
    h = w1.shape[1]
    c = w2.shape[1]

    f_p = _round_up(f, 128)
    h_p = _round_up(h, 128)
    c_p = _round_up(c, 128)
    tm = tile_m if n >= tile_m else _round_up(n, 8)
    n_p = _round_up(n, tm)
    grid = (n_p // tm,)

    # bf16 MXU operands (halves HBM/VMEM traffic), f32 biases / accumulation.
    ahat_p = _pad2(ahat, n_p, n_p).astype(jnp.bfloat16)
    x_p = _pad2(x, n_p, f_p).astype(jnp.bfloat16)
    w1_p = _pad2(w1, f_p, h_p).astype(jnp.bfloat16)
    w2_p = _pad2(w2, h_p, c_p).astype(jnp.bfloat16)
    b1_p = jnp.pad(b1, (0, h_p - h)).reshape(1, h_p).astype(jnp.float32)
    b2_p = jnp.pad(b2, (0, c_p - c)).reshape(1, c_p).astype(jnp.float32)

    cparams = pltpu.CompilerParams(
        dimension_semantics=("parallel",),       # rows independent -> both v7x TCs
        vmem_limit_bytes=32 * 1024 * 1024,       # safe on v5e/v6e/v7x; raise for huge N
    )

    # ---- stage 1: XW1 = X @ W1 (computed once, not per Ahat row tile) ------
    xw1 = pl.pallas_call(
        _xw1_kernel,
        out_shape=jax.ShapeDtypeStruct((n_p, h_p), jnp.bfloat16),
        grid=grid,
        in_specs=[
            pl.BlockSpec((tm, f_p), lambda i: (i, 0)),
            pl.BlockSpec((f_p, h_p), lambda i: (0, 0)),
        ],
        out_specs=pl.BlockSpec((tm, h_p), lambda i: (i, 0)),
        compiler_params=cparams,
    )(x_p, w1_p)

    # ---- stage 2: HW2 = relu(Ahat @ XW1 + b1) @ W2, tiled over node rows ---
    hw2 = pl.pallas_call(
        _layer1_kernel,
        out_shape=jax.ShapeDtypeStruct((n_p, c_p), jnp.bfloat16),
        grid=grid,
        in_specs=[
            pl.BlockSpec((tm, n_p), lambda i: (i, 0)),    # Ahat row tile (streamed)
            pl.BlockSpec((n_p, h_p), lambda i: (0, 0)),   # XW1 resident
            pl.BlockSpec((h_p, c_p), lambda i: (0, 0)),   # W2 resident
            pl.BlockSpec((1, h_p), lambda i: (0, 0)),     # b1
        ],
        out_specs=pl.BlockSpec((tm, c_p), lambda i: (i, 0)),
        compiler_params=cparams,
    )(ahat_p, xw1, w2_p, b1_p)

    # ---- stage 3: Z = Ahat @ HW2 + b2 ; log_softmax over valid classes -----
    out_p = pl.pallas_call(
        functools.partial(_layer2_kernel, n_classes=c),
        out_shape=jax.ShapeDtypeStruct((n_p, c_p), jnp.float32),
        grid=grid,
        in_specs=[
            pl.BlockSpec((tm, n_p), lambda i: (i, 0)),    # Ahat row tile (streamed)
            pl.BlockSpec((n_p, c_p), lambda i: (0, 0)),   # HW2 resident
            pl.BlockSpec((1, c_p), lambda i: (0, 0)),     # b2
        ],
        out_specs=pl.BlockSpec((tm, c_p), lambda i: (i, 0)),
        compiler_params=cparams,
    )(ahat_p, hw2, b2_p)

    return out_p[:n, :c]


# ----------------------------------------------------------------------------
# Plain-JAX glue (graph densification + parameter init) and reference
# ----------------------------------------------------------------------------
def build_normalized_adjacency(edge_index, num_nodes):
    """Dense GCN normalization: D^{-1/2} (A + I) D^{-1/2}.

    edge_index: int32 [2, E], row 0 = source, row 1 = target (PyG convention,
    messages flow source -> target, i.e. A[target, source] = 1). Duplicate
    edges scatter-add (PyG semantics); self-loops added only where missing.
    """
    src, dst = edge_index[0], edge_index[1]
    a = jnp.zeros((num_nodes, num_nodes), jnp.float32).at[dst, src].add(1.0)
    diag = jnp.diagonal(a)
    a = a + jnp.diag(jnp.where(diag > 0, 0.0, 1.0))   # add remaining self-loops
    deg = jnp.sum(a, axis=1)
    dinv = jnp.where(deg > 0, 1.0 / jnp.sqrt(deg), 0.0)
    return dinv[:, None] * a * dinv[None, :]


def init_params(key, n_features, hidden_dim, n_classes):
    """Glorot-uniform weights, zero biases (matches PyG GCNConv reset)."""
    k1, k2 = jax.random.split(key)

    def glorot(k, fan_in, fan_out):
        limit = jnp.sqrt(6.0 / (fan_in + fan_out))
        return jax.random.uniform(k, (fan_in, fan_out), jnp.float32, -limit, limit)

    w1 = glorot(k1, n_features, hidden_dim)
    b1 = jnp.zeros((hidden_dim,), jnp.float32)
    w2 = glorot(k2, hidden_dim, n_classes)
    b2 = jnp.zeros((n_classes,), jnp.float32)
    return w1, b1, w2, b2


def gcn_reference(ahat, x, w1, b1, w2, b2):
    h = jnp.maximum(ahat @ (x @ w1) + b1, 0.0)
    z = ahat @ (h @ w2) + b2
    return jax.nn.log_softmax(z, axis=1)


if __name__ == "__main__":
    # Small synthetic graph: 16 nodes, 8 input features, hidden=16, 4 classes.
    N, F_IN, HIDDEN, N_CLASSES, E = 16, 8, 16, 4, 32

    key = jax.random.PRNGKey(0)
    kx, ke, kp = jax.random.split(key, 3)

    x = jax.random.normal(kx, (N, F_IN), jnp.float32)
    edge_index = jax.random.randint(ke, (2, E), 0, N, dtype=jnp.int32)

    w1, b1, w2, b2 = init_params(kp, F_IN, HIDDEN, N_CLASSES)
    ahat = build_normalized_adjacency(edge_index, N)

    fwd = jax.jit(gcn_forward)
    out = fwd(ahat, x, w1, b1, w2, b2)
    jax.block_until_ready(out)

    # sanity: shape, rows sum (in prob space) to 1, matches f32 reference.
    ref = gcn_reference(ahat, x, w1, b1, w2, b2)
    row_sums = jnp.sum(jnp.exp(out), axis=1)
    assert out.shape == (N, N_CLASSES)
    assert bool(jnp.all(jnp.abs(row_sums - 1.0) < 1e-4))
    assert bool(jnp.max(jnp.abs(out - ref)) < 0.15)   # bf16 matmul tolerance

    print("KERNEL_OK")
</pallas_src>

<mosaic_0001>
module attributes {stable_mosaic.version = 11 : i64} {
  func.func @_xw1_kernel(%arg0: i32, %arg1: memref<16x128xbf16, #tpu.memory_space<vmem>>, %arg2: memref<128x128xbf16, #tpu.memory_space<vmem>>, %arg3: memref<16x128xbf16, #tpu.memory_space<vmem>>) attributes {dimension_semantics = [#tpu.dimension_semantics<parallel>], iteration_bounds = array<i64: 1>, scalar_prefetch = 0 : i64, scratch_operands = 0 : i64, tpu.core_type = #tpu.core_type<tc>, window_params = [{transform_indices = @transform_0, window_bounds = array<i64: 16, 128>}, {pipeline_mode = #tpu.pipeline_mode<synchronous>, transform_indices = @transform_1, window_bounds = array<i64: 128, 128>}, {transform_indices = @transform_2, window_bounds = array<i64: 16, 128>}]} {
    %c0 = arith.constant 0 : index
    %c0_0 = arith.constant 0 : index
    %0 = vector.load %arg1[%c0, %c0_0] : memref<16x128xbf16, #tpu.memory_space<vmem>>, vector<16x128xbf16>
    %c0_1 = arith.constant 0 : index
    %c0_2 = arith.constant 0 : index
    %1 = vector.load %arg2[%c0_1, %c0_2] : memref<128x128xbf16, #tpu.memory_space<vmem>>, vector<128x128xbf16>
    %cst = arith.constant dense<0.000000e+00> : vector<16x128xf32>
    %2 = tpu.matmul %0, %1, %cst {dimension_numbers = #tpu.dot_dimension_numbers<[1], [0], [0], [1], [0, 0, 1, 1], [], []>} : vector<16x128xbf16>, vector<128x128xbf16>, vector<16x128xf32> -> vector<16x128xf32>
    %3 = arith.truncf %2 : vector<16x128xf32> to vector<16x128xbf16>
    %c0_3 = arith.constant 0 : index
    %c0_4 = arith.constant 0 : index
    %4 = vector.load %arg3[%c0_3, %c0_4] : memref<16x128xbf16, #tpu.memory_space<vmem>>, vector<16x128xbf16>
    tpu.vector_store %arg3[%c0_3, %c0_4], %3 {strides = array<i32>} : memref<16x128xbf16, #tpu.memory_space<vmem>>, vector<16x128xbf16>,
    return
  }
  func.func @transform_0(%arg0: i32) -> (i32, i32) {
    %c0_i32 = arith.constant 0 : i32
    %c0_i32_0 = arith.constant 0 : i32
    return %arg0, %c0_i32 : i32, i32
  }
  func.func @transform_1(%arg0: i32) -> (i32, i32) {
    %c0_i32 = arith.constant 0 : i32
    %c0_i32_0 = arith.constant 0 : i32
    %c0_i32_1 = arith.constant 0 : i32
    return %c0_i32, %c0_i32_0 : i32, i32
  }
  func.func @transform_2(%arg0: i32) -> (i32, i32) {
    %c0_i32 = arith.constant 0 : i32
    %c0_i32_0 = arith.constant 0 : i32
    return %arg0, %c0_i32 : i32, i32
  }
}

module attributes {stable_mosaic.version = 11 : i64} {
  func.func @_layer1_kernel(%arg0: i32, %arg1: memref<16x16xbf16, #tpu.memory_space<vmem>>, %arg2: memref<16x128xbf16, #tpu.memory_space<vmem>>, %arg3: memref<128x128xbf16, #tpu.memory_space<vmem>>, %arg4: memref<1x128xf32, #tpu.memory_space<vmem>>, %arg5: memref<16x128xbf16, #tpu.memory_space<vmem>>) attributes {dimension_semantics = [#tpu.dimension_semantics<parallel>], iteration_bounds = array<i64: 1>, scalar_prefetch = 0 : i64, scratch_operands = 0 : i64, tpu.core_type = #tpu.core_type<tc>, window_params = [{transform_indices = @transform_0, window_bounds = array<i64: 16, 16>}, {pipeline_mode = #tpu.pipeline_mode<synchronous>, transform_indices = @transform_1, window_bounds = array<i64: 16, 128>}, {pipeline_mode = #tpu.pipeline_mode<synchronous>, transform_indices = @transform_2, window_bounds = array<i64: 128, 128>}, {pipeline_mode = #tpu.pipeline_mode<synchronous>, transform_indices = @transform_3, window_bounds = array<i64: 1, 128>}, {transform_indices = @transform_4, window_bounds = array<i64: 16, 128>}]} {
    %c0 = arith.constant 0 : index
    %c0_0 = arith.constant 0 : index
    %0 = vector.load %arg1[%c0, %c0_0] : memref<16x16xbf16, #tpu.memory_space<vmem>>, vector<16x16xbf16>
    %c0_1 = arith.constant 0 : index
    %c0_2 = arith.constant 0 : index
    %1 = vector.load %arg2[%c0_1, %c0_2] : memref<16x128xbf16, #tpu.memory_space<vmem>>, vector<16x128xbf16>
    %cst = arith.constant dense<0.000000e+00> : vector<16x128xf32>
    %2 = tpu.matmul %0, %1, %cst {dimension_numbers = #tpu.dot_dimension_numbers<[1], [0], [0], [1], [0, 0, 1, 1], [], []>} : vector<16x16xbf16>, vector<16x128xbf16>, vector<16x128xf32> -> vector<16x128xf32>
    %c0_3 = arith.constant 0 : index
    %c0_4 = arith.constant 0 : index
    %3 = vector.load %arg4[%c0_3, %c0_4] : memref<1x128xf32, #tpu.memory_space<vmem>>, vector<1x128xf32>
    %4 = vector.broadcast %3 : vector<1x128xf32> to vector<16x128xf32>
    %5 = arith.addf %2, %4 : vector<16x128xf32>
    %cst_5 = arith.constant 0.000000e+00 : f32
    %6 = vector.broadcast %cst_5 : f32 to vector<16x128xf32>
    %7 = arith.maximumf %5, %6 : vector<16x128xf32>
    %8 = arith.truncf %7 : vector<16x128xf32> to vector<16x128xbf16>
    %c0_6 = arith.constant 0 : index
    %c0_7 = arith.constant 0 : index
    %9 = vector.load %arg3[%c0_6, %c0_7] : memref<128x128xbf16, #tpu.memory_space<vmem>>, vector<128x128xbf16>
    %cst_8 = arith.constant dense<0.000000e+00> : vector<16x128xf32>
    %10 = tpu.matmul %8, %9, %cst_8 {dimension_numbers = #tpu.dot_dimension_numbers<[1], [0], [0], [1], [0, 0, 1, 1], [], []>} : vector<16x128xbf16>, vector<128x128xbf16>, vector<16x128xf32> -> vector<16x128xf32>
    %11 = arith.truncf %10 : vector<16x128xf32> to vector<16x128xbf16>
    %c0_9 = arith.constant 0 : index
    %c0_10 = arith.constant 0 : index
    %12 = vector.load %arg5[%c0_9, %c0_10] : memref<16x128xbf16, #tpu.memory_space<vmem>>, vector<16x128xbf16>
    tpu.vector_store %arg5[%c0_9, %c0_10], %11 {strides = array<i32>} : memref<16x128xbf16, #tpu.memory_space<vmem>>, vector<16x128xbf16>,
    return
  }
  func.func @transform_0(%arg0: i32) -> (i32, i32) {
    %c0_i32 = arith.constant 0 : i32
    %c0_i32_0 = arith.constant 0 : i32
    return %arg0, %c0_i32 : i32, i32
  }
  func.func @transform_1(%arg0: i32) -> (i32, i32) {
    %c0_i32 = arith.constant 0 : i32
    %c0_i32_0 = arith.constant 0 : i32
    %c0_i32_1 = arith.constant 0 : i32
    return %c0_i32, %c0_i32_0 : i32, i32
  }
  func.func @transform_2(%arg0: i32) -> (i32, i32) {
    %c0_i32 = arith.constant 0 : i32
    %c0_i32_0 = arith.constant 0 : i32
    %c0_i32_1 = arith.constant 0 : i32
    return %c0_i32, %c0_i32_0 : i32, i32
  }
  func.func @transform_3(%arg0: i32) -> (i32, i32) {
    %c0_i32 = arith.constant 0 : i32
    %c0_i32_0 = arith.constant 0 : i32
    %c0_i32_1 = arith.constant 0 : i32
    return %c0_i32, %c0_i32_0 : i32, i32
  }
  func.func @transform_4(%arg0: i32) -> (i32, i32) {
    %c0_i32 = arith.constant 0 : i32
    %c0_i32_0 = arith.constant 0 : i32
    return %arg0, %c0_i32 : i32, i32
  }
}

module attributes {stable_mosaic.version = 11 : i64} {
  func.func @_layer2_kernel(%arg0: i32, %arg1: memref<16x16xbf16, #tpu.memory_space<vmem>>, %arg2: memref<16x128xbf16, #tpu.memory_space<vmem>>, %arg3: memref<1x128xf32, #tpu.memory_space<vmem>>, %arg4: memref<16x128xf32, #tpu.memory_space<vmem>>) attributes {dimension_semantics = [#tpu.dimension_semantics<parallel>], iteration_bounds = array<i64: 1>, scalar_prefetch = 0 : i64, scratch_operands = 0 : i64, tpu.core_type = #tpu.core_type<tc>, window_params = [{transform_indices = @transform_0, window_bounds = array<i64: 16, 16>}, {pipeline_mode = #tpu.pipeline_mode<synchronous>, transform_indices = @transform_1, window_bounds = array<i64: 16, 128>}, {pipeline_mode = #tpu.pipeline_mode<synchronous>, transform_indices = @transform_2, window_bounds = array<i64: 1, 128>}, {transform_indices = @transform_3, window_bounds = array<i64: 16, 128>}]} {
    %c0 = arith.constant 0 : index
    %c0_0 = arith.constant 0 : index
    %0 = vector.load %arg1[%c0, %c0_0] : memref<16x16xbf16, #tpu.memory_space<vmem>>, vector<16x16xbf16>
    %c0_1 = arith.constant 0 : index
    %c0_2 = arith.constant 0 : index
    %1 = vector.load %arg2[%c0_1, %c0_2] : memref<16x128xbf16, #tpu.memory_space<vmem>>, vector<16x128xbf16>
    %cst = arith.constant dense<0.000000e+00> : vector<16x128xf32>
    %2 = tpu.matmul %0, %1, %cst {dimension_numbers = #tpu.dot_dimension_numbers<[1], [0], [0], [1], [0, 0, 1, 1], [], []>} : vector<16x16xbf16>, vector<16x128xbf16>, vector<16x128xf32> -> vector<16x128xf32>
    %c0_3 = arith.constant 0 : index
    %c0_4 = arith.constant 0 : index
    %3 = vector.load %arg3[%c0_3, %c0_4] : memref<1x128xf32, #tpu.memory_space<vmem>>, vector<1x128xf32>
    %4 = vector.broadcast %3 : vector<1x128xf32> to vector<16x128xf32>
    %5 = arith.addf %2, %4 : vector<16x128xf32>
    %6 = tpu.iota {dimensions = array<i32: 1>} : vector<16x128xi32>
    %c4_i32 = arith.constant 4 : i32
    %7 = vector.broadcast %c4_i32 : i32 to vector<16x128xi32>
    %8 = arith.cmpi slt, %6, %7 : vector<16x128xi32>
    %cst_5 = arith.constant -1.000000e+30 : f32
    %9 = vector.broadcast %cst_5 : f32 to vector<16x128xf32>
    %10 = arith.select %8, %5, %9 : vector<16x128xi1>, vector<16x128xf32>
    %cst_6 = arith.constant dense<0xFF800000> : vector<16xf32>
    %11 = vector.multi_reduction <maximumf>, %10, %cst_6 [1] : vector<16x128xf32> to vector<16xf32>
    %12 = vector.shape_cast %11 : vector<16xf32> to vector<16x1xf32>
    %13 = vector.broadcast %12 : vector<16x1xf32> to vector<16x128xf32>
    %14 = arith.subf %5, %13 : vector<16x128xf32>
    %15 = math.exp %14 : vector<16x128xf32>
    %cst_7 = arith.constant 0.000000e+00 : f32
    %16 = vector.broadcast %cst_7 : f32 to vector<16x128xf32>
    %17 = arith.select %8, %15, %16 : vector<16x128xi1>, vector<16x128xf32>
    %cst_8 = arith.constant dense<0.000000e+00> : vector<16xf32>
    %18 = vector.multi_reduction <add>, %17, %cst_8 [1] : vector<16x128xf32> to vector<16xf32>
    %19 = vector.shape_cast %18 : vector<16xf32> to vector<16x1xf32>
    %20 = math.log %19 : vector<16x1xf32>
    %21 = vector.broadcast %12 : vector<16x1xf32> to vector<16x128xf32>
    %22 = arith.subf %5, %21 : vector<16x128xf32>
    %23 = vector.broadcast %20 : vector<16x1xf32> to vector<16x128xf32>
    %24 = arith.subf %22, %23 : vector<16x128xf32>
    %c0_9 = arith.constant 0 : index
    %c0_10 = arith.constant 0 : index
    %25 = vector.load %arg4[%c0_9, %c0_10] : memref<16x128xf32, #tpu.memory_space<vmem>>, vector<16x128xf32>
    tpu.vector_store %arg4[%c0_9, %c0_10], %24 {strides = array<i32>} : memref<16x128xf32, #tpu.memory_space<vmem>>, vector<16x128xf32>,
    return
  }
  func.func @transform_0(%arg0: i32) -> (i32, i32) {
    %c0_i32 = arith.constant 0 : i32
    %c0_i32_0 = arith.constant 0 : i32
    return %arg0, %c0_i32 : i32, i32
  }
  func.func @transform_1(%arg0: i32) -> (i32, i32) {
    %c0_i32 = arith.constant 0 : i32
    %c0_i32_0 = arith.constant 0 : i32
    %c0_i32_1 = arith.constant 0 : i32
    return %c0_i32, %c0_i32_0 : i32, i32
  }
  func.func @transform_2(%arg0: i32) -> (i32, i32) {
    %c0_i32 = arith.constant 0 : i32
    %c0_i32_0 = arith.constant 0 : i32
    %c0_i32_1 = arith.constant 0 : i32
    return %c0_i32, %c0_i32_0 : i32, i32
  }
  func.func @transform_3(%arg0: i32) -> (i32, i32) {
    %c0_i32 = arith.constant 0 : i32
    %c0_i32_0 = arith.constant 0 : i32
    return %arg0, %c0_i32 : i32, i32
  }
}

</mosaic_0001>

<bundles_post_ra>
// kernel: gcn_forward.5
= control target key start
LH: loop header
LB: loop body
LE: loop exit
PB: predicated region body
PF: predicated region fallthrough
CT: control target
= control target key end

     0   :  { %v139_v0 = vmov 0.0   ;;  %vm140_vm0 = vmmov 0   ;;  %vm37_vm1 = vcmask 130048   ;;  %v82_v3 = vlaneseq  ;;  %s180_s1 = inlined_call_operand.vmem [shape: bf16[16,128], index: 1, kind: input, shape index: {}]   ;;  %s181_s0 = inlined_call_operand.vmem [shape: bf16[16,16], index: 0, kind: input, shape index: {}]   ;;  %s182_s2 = inlined_call_operand.vmem [shape: f32[1,128], index: 2, kind: input, shape index: {}]   ;;  %s183_s3 = inlined_call_operand.vmem [shape: f32[16,128], index: 3, kind: output, shape index: {}]  }
   0x1   :  { %121 = vmatprep.subr.bf16.mxu0 %v139_v0  ;;  %v129_v1 = vld [vmem:[%s180_s1] sm:$0xff]   ;;  %123 = vmatprep.mubr.msk.bf16.mxu0 %vm140_vm0, %v139_v0 }
   0x2   :  { %v130_v2 = vld [vmem:[%s181_s0] sm:$0xff]   ;;  %122 = vmatpush3.bf16.msra.mxu0 %v129_v1  ;;  %v83_v4 = vand.u32 127, %v82_v3 }
   0x3   :  { %v115_v5 = vld [vmem:[%s182_s2] ss:$0 sm:$0xff] }
   0x4   :  { %vm84_vm2 = vcmp.lt.s32.totalorder %v83_v4, 4 }
   0x5   :  { %124 = vmatmul.mubr.msk.bf16.vlgmr.msra.gmra.mxu0 %vm37_vm1, %v130_v2 }
  0xc5   :  { %v75_v6 = vpop.f32.mrf.mxu0 }
  0xc6   :  { %v76_v7 = vadd.f32 %v115_v5, %v75_v6 }
  0xc7   :  { %v125_v8 = vpop.f32.mrf.mxu0 }
  0xc8   :  { %v85_v9 = vsel %vm84_vm2, %v76_v7, -1e+30 }
  0xc9   :  { %87 = vmax.xlane.f32.xlu0 %v85_v9  ;;  %v78_v10 = vpop.f32.mrf.mxu0 }
  0xca   :  { %v79_v11 = vadd.f32 %v115_v5, %v78_v10 }
  0xcb   :  { %v126_v12 = vpop.f32.mrf.mxu0 }
  0xcc   :  { %v86_v13 = vsel %vm84_vm2, %v79_v11, -1e+30 }
  0xcd   :  { %89 = vmax.xlane.f32.xlu0 %v86_v13 }
 0x152   :  { %v88_v14 = vpop.xlane.xlu0 %87 }
 0x153   :  { %v91_v15 = vsub.f32 %v76_v7, %v88_v14 }
 0x155   :  { %v93_v16 = vmul.f32 1.442695, %v91_v15 }
 0x156   :  { %v90_v17 = vpop.xlane.xlu0 %89 }
 0x157   :  { %131 = vpow2.f32 %v93_v16  ;;  %v92_v18 = vsub.f32 %v79_v11, %v90_v17 }
 0x159   :  { %v95_v19 = vmul.f32 1.442695, %v92_v18 }
 0x15b   :  { %133 = vpow2.f32 %v95_v19 }
 0x164   :  { %v132_v20 = vpop.eup %131 }
 0x165   :  { %v97_v21 = vsel %vm84_vm2, %v132_v20, 0.0 }
 0x166   :  { %99 = vadd.xlane.f32.xlu1 %v97_v21 }
 0x168   :  { %v134_v22 = vpop.eup %133 }
 0x169   :  { %v98_v23 = vsel %vm84_vm2, %v134_v22, 0.0 }
 0x16a   :  { %101 = vadd.xlane.f32.xlu1 %v98_v23 }
 0x1ef   :  { %v100_v24 = vpop.xlane.xlu1 %99 }
 0x1f0   :  { %135 = vlog2.f32 %v100_v24 }
 0x1f3   :  { %v102_v25 = vpop.xlane.xlu1 %101 }
 0x1f4   :  { %137 = vlog2.f32 %v102_v25 }
 0x1fd   :  { %v136_v26 = vpop.eup %135 }
 0x1fe   :  { %v104_v27 = vmul.f32 0.6931472, %v136_v26 }
 0x200   :  { %v107_v28 = vsub.f32 %v91_v15, %v104_v27 }
 0x201   :  { %v138_v29 = vpop.eup %137 }
 0x202   :  { %109 = vst [vmem:[%s183_s3] sm:$0xff] %v107_v28  ;;  %v106_v30 = vmul.f32 0.6931472, %v138_v29 }
 0x204   :  { %v108_v31 = vsub.f32 %v92_v18, %v106_v30 }
 0x206   :  { %110 = vst [vmem:[%s183_s3 + $0x8] sm:$0xff] %v108_v31 }

// kernel: gcn_forward.4
= control target key start
LH: loop header
LB: loop body
LE: loop exit
PB: predicated region body
PF: predicated region fallthrough
CT: control target
= control target key end

     0   :  { %v277_v0 = vmov 0.0   ;;  %vm278_vm0 = vmmov 0   ;;  %vm40_vm1 = vcmask 130048   ;;  %s340_s1 = inlined_call_operand.vmem [shape: bf16[16,128], index: 1, kind: input, shape index: {}]   ;;  %s341_s0 = inlined_call_operand.vmem [shape: bf16[16,16], index: 0, kind: input, shape index: {}]   ;;  %s342_s2 = inlined_call_operand.vmem [shape: bf16[128,128], index: 2, kind: input, shape index: {}]   ;;  %s343_s3 = inlined_call_operand.vmem [shape: f32[1,128], index: 3, kind: input, shape index: {}]   ;;  %s344_s4 = inlined_call_operand.vmem [shape: bf16[16,128], index: 4, kind: output, shape index: {}]  }
   0x1   :  { %239 = vmatprep.subr.bf16.mxu0 %v277_v0  ;;  %v267_v1 = vld [vmem:[%s340_s1] sm:$0xff]   ;;  %241 = vmatprep.mubr.msk.bf16.mxu0 %vm278_vm0, %v277_v0  ;;  %v269_v3 = vld [vmem:[%s342_s2 + $0x38] sm:$0xff]   ;;  %v270_v4 = vld [vmem:[%s342_s2 + $0x30] sm:$0xff]  }
   0x2   :  { %v268_v2 = vld [vmem:[%s341_s0] sm:$0xff]   ;;  %245 = vmatprep.subr.bf16.mxu1 %v277_v0  ;;  %261 = vmatprep.mubr.msk.bf16.mxu1 %vm278_vm0, %v277_v0  ;;  %v271_v5 = vld [vmem:[%s342_s2 + $0x28] sm:$0xff]   ;;  %v273_v7 = vld [vmem:[%s342_s2 + $0x18] sm:$0xff]  }
   0x3   :  { %240 = vmatpush3.bf16.msra.mxu0 %v267_v1  ;;  %246 = vmatpush3.bf16.msra.mxu1 %v269_v3  ;;  %v272_v6 = vld [vmem:[%s342_s2 + $0x20] sm:$0xff]   ;;  %v274_v8 = vld [vmem:[%s342_s2 + $0x10] sm:$0xff]   ;;  %v275_v9 = vld [vmem:[%s342_s2 + $0x8] sm:$0xff]  }
   0x4   :  { %247 = vmatprep.subr.bf16.mxu1 %v277_v0  ;;  %v276_v10 = vld [vmem:[%s342_s2] sm:$0xff]  }
   0x5   :  { %v207_v11 = vld [vmem:[%s343_s3] ss:$0 sm:$0xff] }
   0x6   :  { %242 = vmatmul.mubr.msk.bf16.vlgmr.msra.gmra.mxu0 %vm40_vm1, %v268_v2 }
   0x7   :  { %248 = vmatpush3.bf16.msra.mxu1 %v270_v4 }
   0x8   :  { %249 = vmatprep.subr.bf16.mxu1 %v277_v0 }
   0xb   :  { %250 = vmatpush3.bf16.msra.mxu1 %v271_v5 }
   0xc   :  { %251 = vmatprep.subr.bf16.mxu1 %v277_v0 }
   0xf   :  { %252 = vmatpush3.bf16.msra.mxu1 %v272_v6 }
  0x10   :  { %253 = vmatprep.subr.bf16.mxu1 %v277_v0 }
  0x13   :  { %254 = vmatpush3.bf16.msra.mxu1 %v273_v7 }
  0x14   :  { %255 = vmatprep.subr.bf16.mxu1 %v277_v0 }
  0x17   :  { %256 = vmatpush3.bf16.msra.mxu1 %v274_v8 }
  0x18   :  { %257 = vmatprep.subr.bf16.mxu1 %v277_v0 }
  0x1b   :  { %258 = vmatpush3.bf16.msra.mxu1 %v275_v9 }
  0x1c   :  { %259 = vmatprep.subr.bf16.mxu1 %v277_v0 }
  0x1f   :  { %260 = vmatpush3.bf16.msra.mxu1 %v276_v10 }
  0xc6   :  { %v78_v12 = vpop.f32.mrf.mxu0 }
  0xc7   :  { %v79_v14 = vadd.f32 %v207_v11, %v78_v12 }
  0xc8   :  { %v243_v13 = vpop.f32.mrf.mxu0 }
  0xc9   :  { %v85_v18 = vmax.f32 %v79_v14, 0.0 }
  0xca   :  { %v81_v15 = vpop.f32.mrf.mxu0 }
  0xcb   :  { %v82_v16 = vadd.f32 %v207_v11, %v81_v15 }
  0xcc   :  { %v244_v17 = vpop.f32.mrf.mxu0 }
  0xcd   :  { %v86_v19 = vmax.f32 %v82_v16, 0.0 }
  0xcf   :  { %v87_v20 = vpack.c.bf16 %v86_v19, %v85_v18 }
  0xd1   :  { %262 = vmatmul.mubr.bf16.vlgmr.msra.gmra.mxu1 %v87_v20 }
 0x191   :  { %v186_v21 = vpop.f32.mrf.mxu1 }
 0x193   :  { %v263_v22 = vpop.f32.mrf.mxu1 }
 0x195   :  { %v189_v23 = vpop.f32.mrf.mxu1 }
 0x196   :  { %v226_v24 = vpack.c.bf16 %v189_v23, %v186_v21 }
 0x197   :  { %v264_v25 = vpop.f32.mrf.mxu1 }
 0x198   :  { %227 = vst [vmem:[%s344_s4] sm:$0xff] %v226_v24  }

// kernel: gcn_forward.3
= control target key start
LH: loop header
LB: loop body
LE: loop exit
PB: predicated region body
PF: predicated region fallthrough
CT: control target
= control target key end

     0   :  { %v197_v0 = vmov 0.0   ;;  %vm198_vm0 = vmmov 0   ;;  %s244_s1 = inlined_call_operand.vmem [shape: bf16[128,128], index: 1, kind: input, shape index: {}]   ;;  %s245_s0 = inlined_call_operand.vmem [shape: bf16[16,128], index: 0, kind: input, shape index: {}]   ;;  %s246_s2 = inlined_call_operand.vmem [shape: bf16[16,128], index: 2, kind: output, shape index: {}]  }
   0x1   :  { %166 = vmatprep.subr.bf16.mxu0 %v197_v0  ;;  %v188_v1 = vld [vmem:[%s244_s1 + $0x38] sm:$0xff]   ;;  %182 = vmatprep.mubr.msk.bf16.mxu0 %vm198_vm0, %v197_v0  ;;  %v189_v2 = vld [vmem:[%s244_s1 + $0x30] sm:$0xff]   ;;  %v190_v3 = vld [vmem:[%s244_s1 + $0x28] sm:$0xff]  }
   0x2   :  { %167 = vmatpush3.bf16.msra.mxu0 %v188_v1  ;;  %v191_v4 = vld [vmem:[%s244_s1 + $0x20] sm:$0xff]   ;;  %v192_v5 = vld [vmem:[%s244_s1 + $0x18] sm:$0xff]   ;;  %v193_v6 = vld [vmem:[%s244_s1 + $0x10] sm:$0xff]  }
   0x3   :  { %168 = vmatprep.subr.bf16.mxu0 %v197_v0  ;;  %v194_v7 = vld [vmem:[%s244_s1 + $0x8] sm:$0xff]   ;;  %v195_v8 = vld [vmem:[%s244_s1] sm:$0xff]  }
   0x4   :  { %v196_v9 = vld [vmem:[%s245_s0] sm:$0xff]  }
   0x6   :  { %169 = vmatpush3.bf16.msra.mxu0 %v189_v2 }
   0x7   :  { %170 = vmatprep.subr.bf16.mxu0 %v197_v0 }
   0xa   :  { %171 = vmatpush3.bf16.msra.mxu0 %v190_v3 }
   0xb   :  { %172 = vmatprep.subr.bf16.mxu0 %v197_v0 }
   0xe   :  { %173 = vmatpush3.bf16.msra.mxu0 %v191_v4 }
   0xf   :  { %174 = vmatprep.subr.bf16.mxu0 %v197_v0 }
  0x12   :  { %175 = vmatpush3.bf16.msra.mxu0 %v192_v5 }
  0x13   :  { %176 = vmatprep.subr.bf16.mxu0 %v197_v0 }
  0x16   :  { %177 = vmatpush3.bf16.msra.mxu0 %v193_v6 }
  0x17   :  { %178 = vmatprep.subr.bf16.mxu0 %v197_v0 }
  0x1a   :  { %179 = vmatpush3.bf16.msra.mxu0 %v194_v7 }
  0x1b   :  { %180 = vmatprep.subr.bf16.mxu0 %v197_v0 }
  0x1e   :  { %181 = vmatpush3.bf16.msra.mxu0 %v195_v8 }
  0x21   :  { %183 = vmatmul.mubr.bf16.vlgmr.msra.gmra.mxu0 %v196_v9 }
  0xe1   :  { %v118_v10 = vpop.f32.mrf.mxu0 }
  0xe3   :  { %v184_v11 = vpop.f32.mrf.mxu0 }
  0xe5   :  { %v121_v12 = vpop.f32.mrf.mxu0 }
  0xe6   :  { %v155_v13 = vpack.c.bf16 %v121_v12, %v118_v10 }
  0xe7   :  { %v185_v14 = vpop.f32.mrf.mxu0 }
  0xe8   :  { %156 = vst [vmem:[%s246_s2] sm:$0xff] %v155_v13  }

</bundles_post_ra>
